<compile_context>
chip_gen: v5e
topology: v5e:2x2
jax: 0.10.0
libtpu: 0.0.40
codegen_flags: <defaults>
</compile_context>

<pallas_src>
import jax
import jax.numpy as jnp
from jax.experimental import pallas as pl
from jax.experimental.pallas import tpu as pltpu


def _round_up(x, m):
    return (x + m - 1) // m * m


# itemsize -> sublane packing multiple for the second-minor block dim.
_SUBLANE_MULT = {4: 8, 2: 16, 1: 32}


def _gate_sigmoid_kernel_mxu(x_ref, w_ref, b_ref, o_ref):
    # x_ref: (TM, D) VMEM (streamed)   w_ref: (D, 128) VMEM, col 0 = w, rest 0 (resident)
    # b_ref: (1,) SMEM f32             o_ref: (TM, 1) VMEM
    # MXU matmul with f32 accumulation; only column 0 is meaningful.
    slab = jnp.dot(x_ref[...], w_ref[...], preferred_element_type=jnp.float32)  # (TM, 128)
    z = slab[:, 0:1] + b_ref[0]
    # sigmoid: exp on the EUP; remaining VPU work is on a (TM, 1) slice -> negligible.
    o_ref[...] = (1.0 / (1.0 + jnp.exp(-z))).astype(o_ref.dtype)


def _gate_sigmoid_kernel_vpu(x_ref, w_ref, b_ref, o_ref):
    # x_ref: (TM, D) VMEM (streamed)   w_ref: (1, D) VMEM f32, lane-dense resident
    # b_ref: (1,) SMEM f32             o_ref: (TM, 1) VMEM
    x = x_ref[...].astype(jnp.float32)                       # f32 accumulation
    z = jnp.sum(x * w_ref[...], axis=-1, keepdims=True)      # VPU mul + XLU lane reduce
    z = z + b_ref[0]
    o_ref[...] = (1.0 / (1.0 + jnp.exp(-z))).astype(o_ref.dtype)


def gate_sigmoid(x, weight, bias, *, max_block_rows=8192,
                 tile_bytes_per_buffer=6 * 1024 * 1024,
                 mxu_dim_threshold=256):
    """Forward of GateSigmoid: sigmoid(x @ weight.T + bias).

    x: (..., dim_in)      (f32 or bf16; accumulation is always f32)
    weight: (1, dim_in)   (PyTorch nn.Linear layout)
    bias: (1,)
    returns (..., 1) with x.dtype.
    """
    dim_in = x.shape[-1]
    lead = x.shape[:-1]
    n = 1
    for s in lead:
        n *= s

    x2d = x.reshape(n, dim_in)
    itemsize = jnp.dtype(x2d.dtype).itemsize
    sub = _SUBLANE_MULT.get(itemsize, 8)          # dtype-correct sublane multiple

    # Row-tile size:
    #  - byte budget per (double-buffered) input tile: ~6 MiB -> near the HBM
    #    roofline knee on all generations, 12 MiB of buffers << v7x's 64 MiB VMEM.
    #  - cap so the grid has >= ~4 steps (keeps both v7x TensorCores busy).
    bytes_per_row = max(dim_in * itemsize, 1)
    mbr = max(sub, (max_block_rows // sub) * sub)
    tm_budget = max(sub, (tile_bytes_per_buffer // bytes_per_row) // sub * sub)
    tm_balance = _round_up(pl.cdiv(n, 4), sub)
    tm = max(sub, min(mbr, tm_budget, tm_balance))

    grid = (pl.cdiv(n, tm),)   # no input padding: last tile is partial, rows are
                               # independent and OOB outputs are masked on writeback.

    b = bias.reshape(1).astype(jnp.float32)

    if dim_in <= mxu_dim_threshold:
        # Small D: XLU reduce + masked stores would bind -> use the idle MXU.
        # Resident (D, 128) weight, column 0 = w, prepared once here (same dtype as x
        # so the MXU runs in its native mode with f32 accumulation).
        w_col = weight.reshape(dim_in, 1).astype(x2d.dtype)
        w_in = jnp.pad(w_col, ((0, 0), (0, 127)))
        w_spec = pl.BlockSpec((dim_in, 128), lambda i: (0, 0))
        kernel = _gate_sigmoid_kernel_mxu
    else:
        # Large D: HBM-bound; keep lane-dense (1, D) f32 weight and VPU reduce.
        w_in = weight.reshape(1, dim_in).astype(jnp.float32)
        w_spec = pl.BlockSpec((1, dim_in), lambda i: (0, 0))
        kernel = _gate_sigmoid_kernel_vpu

    out = pl.pallas_call(
        kernel,
        out_shape=jax.ShapeDtypeStruct((n, 1), x.dtype),
        grid_spec=pltpu.PrefetchScalarGridSpec(
            num_scalar_prefetch=0,
            grid=grid,
            in_specs=[
                pl.BlockSpec((tm, dim_in), lambda i: (i, 0)),        # streamed rows
                w_spec,                                              # resident weight
                pl.BlockSpec(memory_space=pltpu.MemorySpace.SMEM),   # scalar bias
            ],
            out_specs=pl.BlockSpec((tm, 1), lambda i: (i, 0)),
        ),
        compiler_params=pltpu.CompilerParams(
            # Row tiles are independent -> shard across both TensorCores on v7x.
            dimension_semantics=("parallel",),
            vmem_limit_bytes=32 * 1024 * 1024,
        ),
    )(x2d, w_in, b)

    return out.reshape(*lead, 1)


def _reference(x, w, b):
    # Pure f32 reference: sigmoid(x @ w.T + b), summed on the VPU path of XLA.
    z = jnp.sum(x.astype(jnp.float32) * w.astype(jnp.float32).reshape(-1),
                axis=-1, keepdims=True)
    return jax.nn.sigmoid(z + b.astype(jnp.float32)[0])


if __name__ == "__main__":
    key = jax.random.PRNGKey(0)
    kx1, kw1, kb1, kx2, kw2, kb2, kx3 = jax.random.split(key, 7)

    # --- Test 1: module-consistent small shape (batch=2, seq=8, dim_in=32), f32 ---
    # Small D -> MXU path; n=16, TM=8, grid=2.
    batch, seq, dim_in = 2, 8, 32
    bound = 1.0 / (dim_in ** 0.5)   # nn.Linear default init range
    x1 = jax.random.normal(kx1, (batch, seq, dim_in), dtype=jnp.float32)
    w1 = jax.random.uniform(kw1, (1, dim_in), jnp.float32, -bound, bound)
    b1 = jax.random.uniform(kb1, (1,), jnp.float32, -bound, bound)

    out1 = jax.block_until_ready(gate_sigmoid(x1, w1, b1))
    ref1 = _reference(x1, w1, b1)
    assert out1.shape == (batch, seq, 1), out1.shape
    # Tolerance covers MXU f32 pass-decomposition vs exact f32 reduce.
    assert jnp.allclose(out1, ref1, atol=2e-3, rtol=2e-3), "mismatch (MXU path, f32)"

    # --- Test 2: larger dim_in -> VPU-reduce path, ragged row count (n=100, TM=32,
    #     grid=4, partial last tile exercises the no-pad masked writeback) ---
    dim_in2 = 384
    bound2 = 1.0 / (dim_in2 ** 0.5)
    x2 = jax.random.normal(kx2, (4, 25, dim_in2), dtype=jnp.float32)
    w2 = jax.random.uniform(kw2, (1, dim_in2), jnp.float32, -bound2, bound2)
    b2 = jax.random.uniform(kb2, (1,), jnp.float32, -bound2, bound2)

    out2 = jax.block_until_ready(gate_sigmoid(x2, w2, b2))
    ref2 = _reference(x2, w2, b2)
    assert out2.shape == (4, 25, 1), out2.shape
    assert jnp.allclose(out2, ref2, atol=1e-5, rtol=1e-5), "mismatch (VPU path, ragged grid)"

    # --- Test 3: bf16 input -> sublane multiple 16, MXU path, ragged last tile ---
    x3 = jax.random.normal(kx3, (2, 40, dim_in), dtype=jnp.bfloat16)
    w3 = w1.astype(jnp.bfloat16)
    out3 = jax.block_until_ready(gate_sigmoid(x3, w3, b1))
    ref3 = _reference(x3, w3, b1)
    assert out3.shape == (2, 40, 1), out3.shape
    assert jnp.allclose(out3.astype(jnp.float32), ref3, atol=2e-2), "mismatch (bf16)"

    print("KERNEL_OK")
</pallas_src>

<mosaic_0001>
module attributes {stable_mosaic.version = 11 : i64} {
  func.func @_gate_sigmoid_kernel_mxu(%arg0: i32, %arg1: memref<8x32xf32, #tpu.memory_space<vmem>>, %arg2: memref<32x128xf32, #tpu.memory_space<vmem>>, %arg3: memref<1xf32, #tpu.memory_space<smem>>, %arg4: memref<8x1xf32, #tpu.memory_space<vmem>>) attributes {dimension_semantics = [#tpu.dimension_semantics<parallel>], iteration_bounds = array<i64: 2>, scalar_prefetch = 0 : i64, scratch_operands = 0 : i64, tpu.core_type = #tpu.core_type<tc>, window_params = [{transform_indices = @transform_0, window_bounds = array<i64: 8, 32>}, {pipeline_mode = #tpu.pipeline_mode<synchronous>, transform_indices = @transform_1, window_bounds = array<i64: 32, 128>}, {transform_indices = @transform_2, window_bounds = array<i64: 1>}, {transform_indices = @transform_3, window_bounds = array<i64: 8, 1>}]} {
    %c0 = arith.constant 0 : index
    %c0_0 = arith.constant 0 : index
    %0 = vector.load %arg1[%c0, %c0_0] : memref<8x32xf32, #tpu.memory_space<vmem>>, vector<8x32xf32>
    %c0_1 = arith.constant 0 : index
    %c0_2 = arith.constant 0 : index
    %1 = vector.load %arg2[%c0_1, %c0_2] : memref<32x128xf32, #tpu.memory_space<vmem>>, vector<32x128xf32>
    %cst = arith.constant dense<0.000000e+00> : vector<8x128xf32>
    %2 = tpu.matmul %0, %1, %cst {dimension_numbers = #tpu.dot_dimension_numbers<[1], [0], [0], [1], [0, 0, 1, 1], [], []>} : vector<8x32xf32>, vector<32x128xf32>, vector<8x128xf32> -> vector<8x128xf32>
    %3 = vector.extract_strided_slice %2 {offsets = [0, 0], sizes = [8, 1], strides = [1, 1]} : vector<8x128xf32> to vector<8x1xf32>
    %c0_3 = arith.constant 0 : index
    %4 = memref.load %arg3[%c0_3] : memref<1xf32, #tpu.memory_space<smem>>
    %5 = vector.broadcast %4 : f32 to vector<8x1xf32>
    %6 = arith.addf %3, %5 : vector<8x1xf32>
    %cst_4 = arith.constant 0.000000e+00 : f32
    %7 = vector.broadcast %cst_4 : f32 to vector<8x1xf32>
    %8 = arith.subf %7, %6 : vector<8x1xf32>
    %9 = math.exp %8 : vector<8x1xf32>
    %cst_5 = arith.constant 1.000000e+00 : f32
    %10 = vector.broadcast %cst_5 : f32 to vector<8x1xf32>
    %11 = arith.addf %10, %9 : vector<8x1xf32>
    %cst_6 = arith.constant 1.000000e+00 : f32
    %12 = vector.broadcast %cst_6 : f32 to vector<8x1xf32>
    %13 = arith.divf %12, %11 : vector<8x1xf32>
    %c0_7 = arith.constant 0 : index
    %c0_8 = arith.constant 0 : index
    %14 = vector.load %arg4[%c0_7, %c0_8] : memref<8x1xf32, #tpu.memory_space<vmem>>, vector<8x1xf32>
    tpu.vector_store %arg4[%c0_7, %c0_8], %13 {strides = array<i32>} : memref<8x1xf32, #tpu.memory_space<vmem>>, vector<8x1xf32>,
    return
  }
  func.func @transform_0(%arg0: i32) -> (i32, i32) {
    %c0_i32 = arith.constant 0 : i32
    %c0_i32_0 = arith.constant 0 : i32
    return %arg0, %c0_i32 : i32, i32
  }
  func.func @transform_1(%arg0: i32) -> (i32, i32) {
    %c0_i32 = arith.constant 0 : i32
    %c0_i32_0 = arith.constant 0 : i32
    %c0_i32_1 = arith.constant 0 : i32
    return %c0_i32, %c0_i32_0 : i32, i32
  }
  func.func @transform_2(%arg0: i32) -> i32 {
    %c0_i32 = arith.constant 0 : i32
    %c0_i32_0 = arith.constant 0 : i32
    return %c0_i32 : i32
  }
  func.func @transform_3(%arg0: i32) -> (i32, i32) {
    %c0_i32 = arith.constant 0 : i32
    %c0_i32_0 = arith.constant 0 : i32
    return %arg0, %c0_i32 : i32, i32
  }
}

</mosaic_0001>

<bundles_post_ra>
// kernel: tpu_custom_call.1
= control target key start
LH: loop header
LB: loop body
LE: loop exit
PB: predicated region body
PF: predicated region fallthrough
CT: control target
= control target key end

     0   :  { %s632_s0 = inlined_call_operand.hbm [shape: f32[16,32], index: 0, kind: input, shape index: {}]   ;;  %s633_s1 = inlined_call_operand.hbm [shape: f32[32,128], index: 1, kind: input, shape index: {}]   ;;  %s634_s2 = inlined_call_operand.<no memory space> [shape: f32[1], index: 2, kind: input, shape index: {}]   ;;  %s635_s3 = inlined_call_operand.vmem [shape: f32[16,1], index: 3, kind: output, shape index: {}]  }
   0x1   :  { %8 = sst [smem:[#allocation2]] %s634_s2 }
   0x2   :  { %9 = vsyncpa [#allocation4], 0 }
   0x3   :  { %11 = vsyncpa [#allocation4 + $0x1], 0 }
   0x4   :  { %12 = vsyncpa [#allocation6], 0  ;;  %s529_s14 = smov 0   ;;  %s531_s15 = smov 0  }
   0x5   :  { %s533_s16 = smov 0   ;;  %s535_s17 = smov 0  }
   0x6 LB: > { %s128_s19 = sshll.u32 %s633_s1, 4  ;;  %s551_s20 = sadd.s32 4294967295, %s501_s17   ;;  %s501_s17 = sphi %s535_s17, %s642_s17   ;;  %s497_s16 = sphi %s533_s16, %s641_s16   ;;  %s493_s15 = sphi %s531_s15, %s640_s15   ;;  %s489_s14 = sphi %s529_s14, %s639_s14   ;;  %s129_s19 = int_to_ptr.hbm [resolvable:$true] %s128_s19 }
   0x7   : > { %p335_p0 = scmp.ge.s32.totalorder %s501_s17, 1  ;;  %p39_p1 = scmp.eq.s32.totalorder %s551_s20, 0 }
   0x8   : > { %p117_p2 = scmp.lt.s32.totalorder %s501_s17, 3  ;;  %s503_s22 = smov [#allocation5]  }
   0x9   : > { %s130_s23 = sshll.u32 %s503_s22, 4  ;;  %s504_s24 = smov 128   ;;  %s131_s23 = int_to_ptr.vmem [resolvable:$true] %s130_s23 }
   0xa   : > { %p556_p3 = pnand %p335_p0, %p117_p2  ;;  %s505_s25 = smov 8  }
   0xb   : > { %s565_s26 = sadd.s32 1, %s501_s17   ;;  %s25_s28 = sadd.s32 1, %s497_s16 }
   0xc   : > { %p353_p4 = pneg %p556_p3  ;;  %s22_s27 = ssub.s32 %s501_s17, %s565_s26 }
   0xd   : > { %p23_p6 = scmp.eq.s32.totalorder %s22_s27, 0  ;;  %p32_p7 = scmp.ne.s32.totalorder %s497_s16, %s493_s15 }
   0xe   : > { %p354_p5 = pnand %p353_p4, %p39_p1  ;;  %p33_p8 = scmp.eq.s32.totalorder %s501_s17, 0 }
   0xf   : > { %p38_p9 = scmp.ne.s32.totalorder %s493_s15, %s489_s14  ;;  %p362_p12 = scmp.lt.s32.totalorder %s501_s17, 2 }
  0x10   : > { %356 = dma.hbm_to_vmem [thread:$0]  (!%p354_p5), %s129_s19, 512, %s131_s23, [#allocation6], %s504_s24, %s504_s24, %s505_s25  }
  0x11   : > { %s575_s29 = scalar_select %p23_p6, %s497_s16, %s25_s28  }
  0x12   : > { %p34_p10 = por %p33_p8, %p32_p7  ;;  %p579_p11 = por %p39_p1, %p38_p9 }
  0x13   : > { %s147_s4 = sand.u32 1, %s497_s16   ;;  %s339_s6 = sshll.u32 %s501_s17, 3 }
  0x14   : > { %s338_s5 = sshll.u32 %s147_s4, 3  ;;  %s155_s9 = scalar_lea.hbm %s632_s0, %s339_s6 }
  0x15   : > { %s151_s10 = scalar_lea.vmem [#allocation3], %s338_s5  ;;  %s157_s12 = sshll.u32 %s155_s9, 4  ;;  %s158_s12 = int_to_ptr.hbm [resolvable:$true] %s157_s12 }
  0x16   : > { %s159_s11 = sshll.u32 %s151_s10, 4  ;;  %p589_p13 = pnand %p362_p12, %p34_p10  ;;  %s160_s11 = int_to_ptr.vmem [resolvable:$true] %s159_s11 }
  0x17   : > { %s148_s14 = scalar_lea.sflag [#allocation4], %s147_s4  ;;  %s433_s2 = sshra.s32 %s158_s12, 4  ;;  %s434_s2 = int_to_ptr.hbm [resolvable:$true] %s433_s2 }
  0x18   : > { %s435_s18 = scalar_lea.hbm %s434_s2, 8  ;;  %p437_p2 = pneg %p589_p13 }
  0x19   : > { %p436_p0 = scmp.ne.s32.totalorder %s434_s2, %s435_s18  ;;  %s440_s22 = scalar_lea.hbm %s632_s0, 16 }
  0x1a   : > { %p441_p6 = scmp.lt.s32.totalorder %s434_s2, %s632_s0  ;;  %p442_p7 = scmp.lt.s32.totalorder %s440_s22, %s435_s18 }
  0x1b   : > { %p438_p4 = pnand %p437_p2, %p436_p0 }
  0x1c   : > { %p443_p8 = por %p442_p7, %p441_p6 }
  0x1d   : > { %p439_p5 = pneg %p438_p4 }
  0x1f   : > { %p444_p9 = pnand %p443_p8, %p439_p5 }
  0x21   : > { %447 = shalt.err (!%p444_p9)
}
  0x22   : > { %360 = dma.hbm_to_vmem [thread:$0]  (!%p589_p13), %s158_s12, 128, %s160_s11, %s148_s14  }
  0x23   : > { %168 = sbr.rel (%p556_p3) target bundleno = 210 (0xd2), region = 32  ;;  %s170_s25 = sand.u32 (!%p556_p3), 1, %s493_s15  }
  0x24   : > { %s341_s27 = sshll.u32 (!%p556_p3), %s170_s25, 3  ;;  %s171_s28 = scalar_lea.sflag (!%p556_p3), [#allocation4], %s170_s25 }
  0x25   : > { %s174_s4 = scalar_lea.vmem (!%p556_p3), [#allocation3], %s341_s27 }
  0x28   : > { %480 = dma.done.wait (%p579_p11), %s171_s28, 128  }
  0x29   : > { %482 = vsyncadd (%p579_p11), %s171_s28, 4294967168 }
  0x2a   : > { %484 = dma.done.wait (%p39_p1), [#allocation6], 512  }
  0x2b   : > { %486 = vsyncadd (%p39_p1), [#allocation6], 4294966784  ;;  %v210_v0 = vld [vmem:[#allocation5 + $0x18] sm:$0xff]  ;;  %v209_v1 = vld [vmem:[#allocation5 + $0x10] sm:$0xff]  ;;  %vm211_vm0 = vcmask 261120   ;;  %s235_s21 = sld [smem:[#allocation2]] }
  0x2c   : > { %227 = vmatpush.msra.mxu0 %v210_v0  ;;  %v208_v2 = vld [vmem:[#allocation5 + $0x8] sm:$0xff]  ;;  %v207_v3 = vld [vmem:[#allocation5] sm:$0xff]  ;;  %v206_v4 = vld [vmem:[%s174_s4] sm:$0xff]  ;;  %p202_p1 = scmp.lt.s32.totalorder %s551_s20, 1  ;;  %vm257_vm4 = vcmask 7168  }
  0x2e   : > { %228 = vmatpush.msra.mxu0 %v209_v1  ;;  %s644_s20 = smov (!%p202_p1, %s551_s20), 1 }
  0x2f   : > { %s343_s30 = sshll.u32 %s644_s20, 3 }
  0x30   : > { %229 = vmatpush.msra.mxu0 %v208_v2  ;;  %s205_s7 = scalar_lea.vmem %s635_s3, %s343_s30 }
  0x31   : > { %v236_v5 = vstv %s235_s21 }
  0x32   : > { %230 = vmatpush.msra.mxu0 %v207_v3 }
  0x33   : > { %344 = vmatmul.msk.f32.vlgmr.msra.gmra.mxu0 %vm211_vm0, %v206_v4 }
  0xb0   : > { %v232_v6 = vpop.f32.mrf.mxu0 }
  0xb1   : > { %v237_v7 = vadd.f32 %v236_v5, %v232_v6 }
  0xb3   : > { %v238_v8 = vsub.f32 0.0, %v237_v7 }
  0xb5   : > { %v239_v9 = vmul.f32 1.442695, %v238_v8 }
  0xb7   : > { %399 = vpow2.f32 %v239_v9 }
  0xbd   : > { %v400_v10 = vpop.eup %399 }
  0xbe   : > { %v241_v11 = vadd.f32 1.0, %v400_v10 }
  0xc0   : > { %401 = vrcp.f32 %v241_v11  ;;  %v253_v15 = vand.u32 2147483648, %v241_v11  ;;  %v251_v17 = vand.u32 2147483647, %v241_v11  ;;  %vm247_vm2 = vweird.f32 %v241_v11 }
  0xc2   : > { %v254_v19 = vor.u32 1.1754944e-38, %v253_v15  ;;  %vm252_vm5 = vcmp.eq.f32.partialorder %v251_v17, 8.507059e+37 }
  0xc6   : > { %v402_v12 = vpop.eup %401 }
  0xc7   : > { %v243_v13 = vmul.f32 %v402_v12, %v241_v11  ;;  %vm248_vm1 = vweird.f32 %v402_v12 }
  0xc8   : > { %vm249_vm3 = vmor %vm247_vm2, %vm248_vm1 }
  0xc9   : > { %v244_v14 = vsub.f32 1.0, %v243_v13 }
  0xcb   : > { %v245_v16 = vmul.f32 %v402_v12, %v244_v14 }
  0xcd   : > { %v246_v18 = vadd.f32 %v402_v12, %v245_v16 }
  0xcf   : > { %v250_v20 = vsel %vm249_vm3, %v402_v12, %v246_v18 }
  0xd0   : > { %v255_v21 = vsel %vm252_vm5, %v254_v19, %v250_v20 }
  0xd1   : > { %258 = vst.msk [vmem:[%s205_s7] sm:$0xff] %vm257_vm4, %v255_v21 }
  0xd2 PF: > { %p15_p3 = scmp.ge.s32.totalorder %s565_s26, 4   ;;  %s639_s14 = smov %s493_s15 }
  0xd3   : > { %s640_s15 = smov %s497_s16  ;;  %s641_s16 = smov %s575_s29 }
  0xd4   : > { %s642_s17 = smov %s565_s26  ;;  %17 = sbr.rel (!%p15_p3) target bundleno = 6 (0x6), region = 76 }
  0xd9   :  { %278 = vsyncpa [#allocation4], 1 }
  0xda   :  { %280 = vsyncpa [#allocation4 + $0x1], 1 }
  0xdb   :  { %281 = vsyncpa [#allocation6], 1 }

</bundles_post_ra>
